<compile_context>
chip_gen: v7x
topology: tpu7x:2x2x1
jax: 0.10.0
libtpu: 0.0.40
codegen_flags: <defaults>
</compile_context>

<pallas_src>
import jax
import jax.numpy as jnp
import numpy as np
from jax.experimental import pallas as pl
from jax.experimental.pallas import tpu as pltpu

_MIB = 1024 * 1024


def _channel_attention_kernel(
    x_ref,                      # (Bt, C, HW)  f32 (full spatial extent, no padding)
    w1_ref,                     # (C, 2*Hd)  = [W1m | W1a]
    b1_ref,                     # (1, 2*Hd)  = [b1m | b1a]
    w2_ref,                     # (2*Hd, C)  = [W2m ; W2a]
    b2_ref,                     # (2, C)     = [b2m ; b2a]
    o_ref,                      # (Bt, C, HW)  f32
):
    x = x_ref[...]                                   # (Bt, C, HW)
    bt = x.shape[0]
    hw = x.shape[-1]
    hd = w1_ref.shape[1] // 2

    # Adaptive pooling to 1x1 == global max / mean over the spatial dim.
    mx = jnp.max(x, axis=-1)                         # (Bt, C)
    av = jnp.sum(x, axis=-1) * (1.0 / hw)            # (Bt, C)

    # Grouped MLP: stack [max-pooled ; avg-pooled] along the sublane axis and run one wide
    # matmul per layer; the off-diagonal (cross-branch) blocks are masked out after layer 1.
    p = jnp.concatenate([mx, av], axis=0)            # (2*Bt, C)
    h = jnp.dot(p, w1_ref[...], preferred_element_type=jnp.float32) + b1_ref[...]
    h = jnp.maximum(h, 0.0)                          # ReLU, (2*Bt, 2*Hd)

    row = jax.lax.broadcasted_iota(jnp.int32, h.shape, 0)
    col = jax.lax.broadcasted_iota(jnp.int32, h.shape, 1)
    h = jnp.where((row < bt) == (col < hd), h, 0.0)  # keep max|max and avg|avg blocks only

    o = jnp.dot(h, w2_ref[...], preferred_element_type=jnp.float32)   # (2*Bt, C)
    max_w = jax.nn.sigmoid(o[:bt] + b2_ref[0:1, :])  # (Bt, C)
    avg_w = jax.nn.sigmoid(o[bt:] + b2_ref[1:2, :])  # (Bt, C)

    weight = jax.nn.sigmoid(max_w + avg_w)           # (Bt, C)  (double sigmoid, as in module)

    # Broadcast channel weights over the spatial dim and scale the input.
    o_ref[...] = x * weight[:, :, None]


def _vmem_capacity_bytes():
    try:
        return int(pltpu.get_tpu_info().vmem_capacity_bytes)
    except Exception:
        return 64 * _MIB                             # conservative fallback (v7x per-TC VMEM)


def _choose_batch_tile(B, per_item_bytes, budget_bytes, min_split_tile_bytes=2 * _MIB):
    """Largest divisor of B whose (Bt, C, HW) f32 tile fits `budget_bytes`.

    Only enforce >=2 grid steps (for the v7x 2-TC megacore split) when each half-batch tile
    would still be >= min_split_tile_bytes; otherwise prefer one big tile per step."""
    cap = max(1, budget_bytes // per_item_bytes)
    if B >= 2 and (B // 2) * per_item_bytes >= min_split_tile_bytes:
        cap = min(cap, B // 2)
    cap = min(cap, B)
    for cand in range(cap, 0, -1):
        if B % cand == 0:
            return cand
    return 1


def channel_attention(x_nchw, params):
    """x_nchw: (B, C, H, W) float32.  params: dict of MLP weights/biases (see init_params)."""
    B, C, H, W = x_nchw.shape
    HW = H * W
    x = x_nchw.reshape(B, C, HW)                     # unpadded; blocks use full (C, HW) extents

    # Fuse the two branches' weights host-side: 4 resident arrays instead of 8
    # (and wider matmuls inside the kernel).
    w1 = jnp.concatenate([params["w1m"], params["w1a"]], axis=1)   # (C, 2*Hd)
    b1 = jnp.concatenate([params["b1m"], params["b1a"]], axis=1)   # (1, 2*Hd)
    w2 = jnp.concatenate([params["w2m"], params["w2a"]], axis=0)   # (2*Hd, C)
    b2 = jnp.concatenate([params["b2m"], params["b2a"]], axis=0)   # (2, C)

    weight_bytes = sum(int(np.prod(a.shape)) * 4 for a in (w1, b1, w2, b2))
    per_item = C * HW * 4
    headroom = 4 * _MIB

    vmem_cap = _vmem_capacity_bytes()
    footprint_cap = (vmem_cap * 3) // 4              # ~48 MiB on v7x, ~96 MiB on v5e/v6e
    # Double-buffered in + out x tiles -> 4x tile bytes live, plus (double-buffered) weights.
    tile_budget = (footprint_cap - 2 * weight_bytes - headroom) // 4
    tile_budget = max(_MIB, min(16 * _MIB, tile_budget))

    if per_item <= tile_budget:
        bt = _choose_batch_tile(B, per_item, tile_budget)
        x_buffers = 2
        x_pipeline_mode = None
    else:
        # Oversized single item: single-buffer the x in/out streams so the live footprint halves.
        # TODO(synk): for items exceeding even the single-buffered budget, add a second
        # 'arbitrary' spatial grid axis with pool-accumulate followed by a scale pass.
        bt = 1
        x_buffers = 1
        x_pipeline_mode = pl.Buffered(1)

    grid = (B // bt,)
    tile_bytes = bt * per_item
    live_bytes = 2 * x_buffers * tile_bytes + 2 * weight_bytes
    vmem_limit = int(min(footprint_cap, max(32 * _MIB, live_bytes + headroom)))

    def x_spec():
        if x_pipeline_mode is None:
            return pl.BlockSpec((bt, C, HW), lambda b: (b, 0, 0))
        return pl.BlockSpec((bt, C, HW), lambda b: (b, 0, 0), pipeline_mode=x_pipeline_mode)

    full2d = lambda arr: pl.BlockSpec(arr.shape, lambda b: (0, 0))

    out = pl.pallas_call(
        _channel_attention_kernel,
        out_shape=jax.ShapeDtypeStruct((B, C, HW), x.dtype),
        grid_spec=pltpu.PrefetchScalarGridSpec(
            num_scalar_prefetch=0,
            grid=grid,
            in_specs=[x_spec(), full2d(w1), full2d(b1), full2d(w2), full2d(b2)],
            out_specs=x_spec(),
        ),
        compiler_params=pltpu.CompilerParams(
            dimension_semantics=("parallel",),
            vmem_limit_bytes=vmem_limit,
        ),
    )(x, w1, b1, w2, b2)

    return out.reshape(B, C, H, W)


def reference_channel_attention(x, params):
    """Pure-JAX reference mirroring the PyTorch forward."""
    B, C, H, W = x.shape
    mx = jnp.max(x.reshape(B, C, -1), axis=-1)
    av = jnp.mean(x.reshape(B, C, -1), axis=-1)

    def mlp(v, w1, b1, w2, b2):
        h = jnp.maximum(v @ w1 + b1, 0.0)
        return jax.nn.sigmoid(h @ w2 + b2)

    mw = mlp(mx, params["w1m"], params["b1m"][0], params["w2m"], params["b2m"][0])
    aw = mlp(av, params["w1a"], params["b1a"][0], params["w2a"], params["b2a"][0])
    weight = jax.nn.sigmoid(mw + aw)
    return weight[:, :, None, None] * x


def init_params(key, in_channel, r=16):
    hidden = int(in_channel // r)
    ks = jax.random.split(key, 8)
    s1 = 1.0 / np.sqrt(in_channel)
    s2 = 1.0 / np.sqrt(hidden)
    # Stored as (in, out) so the kernel computes v @ W + b (== PyTorch Linear).
    return {
        "w1m": jax.random.uniform(ks[0], (in_channel, hidden), jnp.float32, -s1, s1),
        "b1m": jax.random.uniform(ks[1], (1, hidden), jnp.float32, -s1, s1),
        "w2m": jax.random.uniform(ks[2], (hidden, in_channel), jnp.float32, -s2, s2),
        "b2m": jax.random.uniform(ks[3], (1, in_channel), jnp.float32, -s2, s2),
        "w1a": jax.random.uniform(ks[4], (in_channel, hidden), jnp.float32, -s1, s1),
        "b1a": jax.random.uniform(ks[5], (1, hidden), jnp.float32, -s1, s1),
        "w2a": jax.random.uniform(ks[6], (hidden, in_channel), jnp.float32, -s2, s2),
        "b2a": jax.random.uniform(ks[7], (1, in_channel), jnp.float32, -s2, s2),
    }


if __name__ == "__main__":
    key = jax.random.PRNGKey(0)

    # Test 1: lane-aligned spatial size (HW = 256).
    B, C, H, W = 2, 32, 16, 16
    kx, kp, key = jax.random.split(key, 3)
    x = jax.random.normal(kx, (B, C, H, W), dtype=jnp.float32)
    params = init_params(kp, C, r=16)
    out = jax.block_until_ready(channel_attention(x, params))
    ref = reference_channel_attention(x, params)
    np.testing.assert_allclose(np.asarray(out), np.asarray(ref), rtol=1e-5, atol=1e-5)

    # Test 2: non-128-aligned spatial size (HW = 49) — no pad, no slice, full-extent blocks.
    B2, C2, H2, W2 = 8, 32, 7, 7
    kx2, kp2 = jax.random.split(key)
    x2 = jax.random.normal(kx2, (B2, C2, H2, W2), dtype=jnp.float32)
    params2 = init_params(kp2, C2, r=16)
    out2 = jax.block_until_ready(channel_attention(x2, params2))
    ref2 = reference_channel_attention(x2, params2)
    np.testing.assert_allclose(np.asarray(out2), np.asarray(ref2), rtol=1e-5, atol=1e-5)

    print("KERNEL_OK")
</pallas_src>

<mosaic_0001>
module attributes {stable_mosaic.version = 11 : i64} {
  func.func @_channel_attention_kernel(%arg0: i32, %arg1: memref<2x32x256xf32, #tpu.memory_space<vmem>>, %arg2: memref<32x4xf32, #tpu.memory_space<vmem>>, %arg3: memref<1x4xf32, #tpu.memory_space<vmem>>, %arg4: memref<4x32xf32, #tpu.memory_space<vmem>>, %arg5: memref<2x32xf32, #tpu.memory_space<vmem>>, %arg6: memref<2x32x256xf32, #tpu.memory_space<vmem>>) attributes {dimension_semantics = [#tpu.dimension_semantics<parallel>], iteration_bounds = array<i64: 1>, scalar_prefetch = 0 : i64, scratch_operands = 0 : i64, tpu.core_type = #tpu.core_type<tc>, window_params = [{transform_indices = @transform_0, window_bounds = array<i64: 2, 32, 256>}, {pipeline_mode = #tpu.pipeline_mode<synchronous>, transform_indices = @transform_1, window_bounds = array<i64: 32, 4>}, {pipeline_mode = #tpu.pipeline_mode<synchronous>, transform_indices = @transform_2, window_bounds = array<i64: 1, 4>}, {pipeline_mode = #tpu.pipeline_mode<synchronous>, transform_indices = @transform_3, window_bounds = array<i64: 4, 32>}, {pipeline_mode = #tpu.pipeline_mode<synchronous>, transform_indices = @transform_4, window_bounds = array<i64: 2, 32>}, {transform_indices = @transform_5, window_bounds = array<i64: 2, 32, 256>}]} {
    %c0 = arith.constant 0 : index
    %c0_0 = arith.constant 0 : index
    %c0_1 = arith.constant 0 : index
    %0 = vector.load %arg1[%c0, %c0_0, %c0_1] : memref<2x32x256xf32, #tpu.memory_space<vmem>>, vector<2x32x256xf32>
    %cst = arith.constant dense<0xFF800000> : vector<2x32xf32>
    %1 = vector.multi_reduction <maximumf>, %0, %cst [2] : vector<2x32x256xf32> to vector<2x32xf32>
    %cst_2 = arith.constant dense<0.000000e+00> : vector<2x32xf32>
    %2 = vector.multi_reduction <add>, %0, %cst_2 [2] : vector<2x32x256xf32> to vector<2x32xf32>
    %cst_3 = arith.constant 3.906250e-03 : f32
    %3 = vector.broadcast %cst_3 : f32 to vector<2x32xf32>
    %4 = arith.mulf %2, %3 : vector<2x32xf32>
    %5 = tpu.concatenate %1, %4 in 0 : vector<2x32xf32>, vector<2x32xf32> -> vector<4x32xf32>
    %c0_4 = arith.constant 0 : index
    %c0_5 = arith.constant 0 : index
    %6 = vector.load %arg2[%c0_4, %c0_5] : memref<32x4xf32, #tpu.memory_space<vmem>>, vector<32x4xf32>
    %cst_6 = arith.constant dense<0.000000e+00> : vector<4x4xf32>
    %7 = tpu.matmul %5, %6, %cst_6 {dimension_numbers = #tpu.dot_dimension_numbers<[1], [0], [0], [1], [0, 0, 1, 1], [], []>} : vector<4x32xf32>, vector<32x4xf32>, vector<4x4xf32> -> vector<4x4xf32>
    %c0_7 = arith.constant 0 : index
    %c0_8 = arith.constant 0 : index
    %8 = vector.load %arg3[%c0_7, %c0_8] : memref<1x4xf32, #tpu.memory_space<vmem>>, vector<1x4xf32>
    %9 = vector.broadcast %8 : vector<1x4xf32> to vector<4x4xf32>
    %10 = arith.addf %7, %9 : vector<4x4xf32>
    %cst_9 = arith.constant 0.000000e+00 : f32
    %11 = vector.broadcast %cst_9 : f32 to vector<4x4xf32>
    %12 = arith.maximumf %10, %11 : vector<4x4xf32>
    %13 = tpu.iota {dimensions = array<i32: 0>} : vector<4x4xi32>
    %14 = tpu.iota {dimensions = array<i32: 1>} : vector<4x4xi32>
    %c2_i32 = arith.constant 2 : i32
    %15 = vector.broadcast %c2_i32 : i32 to vector<4x4xi32>
    %16 = arith.cmpi slt, %13, %15 : vector<4x4xi32>
    %c2_i32_10 = arith.constant 2 : i32
    %17 = vector.broadcast %c2_i32_10 : i32 to vector<4x4xi32>
    %18 = arith.cmpi slt, %14, %17 : vector<4x4xi32>
    %19 = arith.xori %16, %18 : vector<4x4xi1>
    %cst_11 = arith.constant dense<true> : vector<4x4xi1>
    %20 = arith.xori %19, %cst_11 : vector<4x4xi1>
    %cst_12 = arith.constant 0.000000e+00 : f32
    %21 = vector.broadcast %cst_12 : f32 to vector<4x4xf32>
    %22 = arith.select %20, %12, %21 : vector<4x4xi1>, vector<4x4xf32>
    %c0_13 = arith.constant 0 : index
    %c0_14 = arith.constant 0 : index
    %23 = vector.load %arg4[%c0_13, %c0_14] : memref<4x32xf32, #tpu.memory_space<vmem>>, vector<4x32xf32>
    %cst_15 = arith.constant dense<0.000000e+00> : vector<4x32xf32>
    %24 = tpu.matmul %22, %23, %cst_15 {dimension_numbers = #tpu.dot_dimension_numbers<[1], [0], [0], [1], [0, 0, 1, 1], [], []>} : vector<4x4xf32>, vector<4x32xf32>, vector<4x32xf32> -> vector<4x32xf32>
    %25 = vector.extract_strided_slice %24 {offsets = [0, 0], sizes = [2, 32], strides = [1, 1]} : vector<4x32xf32> to vector<2x32xf32>
    %c0_16 = arith.constant 0 : index
    %c0_17 = arith.constant 0 : index
    %26 = vector.load %arg5[%c0_16, %c0_17] : memref<2x32xf32, #tpu.memory_space<vmem>>, vector<1x32xf32>
    %27 = vector.broadcast %26 : vector<1x32xf32> to vector<2x32xf32>
    %28 = arith.addf %25, %27 : vector<2x32xf32>
    %29 = arith.negf %28 : vector<2x32xf32>
    %30 = math.exp %29 : vector<2x32xf32>
    %cst_18 = arith.constant 1.000000e+00 : f32
    %31 = vector.broadcast %cst_18 : f32 to vector<2x32xf32>
    %32 = arith.addf %31, %30 : vector<2x32xf32>
    %33 = arith.divf %31, %32 : vector<2x32xf32>
    %34 = vector.extract_strided_slice %24 {offsets = [2, 0], sizes = [2, 32], strides = [1, 1]} : vector<4x32xf32> to vector<2x32xf32>
    %c1 = arith.constant 1 : index
    %c0_19 = arith.constant 0 : index
    %35 = vector.load %arg5[%c1, %c0_19] : memref<2x32xf32, #tpu.memory_space<vmem>>, vector<1x32xf32>
    %36 = vector.broadcast %35 : vector<1x32xf32> to vector<2x32xf32>
    %37 = arith.addf %34, %36 : vector<2x32xf32>
    %38 = arith.negf %37 : vector<2x32xf32>
    %39 = math.exp %38 : vector<2x32xf32>
    %cst_20 = arith.constant 1.000000e+00 : f32
    %40 = vector.broadcast %cst_20 : f32 to vector<2x32xf32>
    %41 = arith.addf %40, %39 : vector<2x32xf32>
    %42 = arith.divf %40, %41 : vector<2x32xf32>
    %43 = arith.addf %33, %42 : vector<2x32xf32>
    %44 = arith.negf %43 : vector<2x32xf32>
    %45 = math.exp %44 : vector<2x32xf32>
    %cst_21 = arith.constant 1.000000e+00 : f32
    %46 = vector.broadcast %cst_21 : f32 to vector<2x32xf32>
    %47 = arith.addf %46, %45 : vector<2x32xf32>
    %48 = arith.divf %46, %47 : vector<2x32xf32>
    %49 = vector.shape_cast %48 : vector<2x32xf32> to vector<2x32x1xf32>
    %50 = vector.broadcast %49 : vector<2x32x1xf32> to vector<2x32x256xf32>
    %51 = arith.mulf %0, %50 : vector<2x32x256xf32>
    %c0_22 = arith.constant 0 : index
    %c0_23 = arith.constant 0 : index
    %c0_24 = arith.constant 0 : index
    %52 = vector.load %arg6[%c0_22, %c0_23, %c0_24] : memref<2x32x256xf32, #tpu.memory_space<vmem>>, vector<2x32x256xf32>
    tpu.vector_store %arg6[%c0_22, %c0_23, %c0_24], %51 {strides = array<i32>} : memref<2x32x256xf32, #tpu.memory_space<vmem>>, vector<2x32x256xf32>,
    return
  }
  func.func @transform_0(%arg0: i32) -> (i32, i32, i32) {
    %c0_i32 = arith.constant 0 : i32
    %c0_i32_0 = arith.constant 0 : i32
    %c0_i32_1 = arith.constant 0 : i32
    return %arg0, %c0_i32, %c0_i32_0 : i32, i32, i32
  }
  func.func @transform_1(%arg0: i32) -> (i32, i32) {
    %c0_i32 = arith.constant 0 : i32
    %c0_i32_0 = arith.constant 0 : i32
    %c0_i32_1 = arith.constant 0 : i32
    return %c0_i32, %c0_i32_0 : i32, i32
  }
  func.func @transform_2(%arg0: i32) -> (i32, i32) {
    %c0_i32 = arith.constant 0 : i32
    %c0_i32_0 = arith.constant 0 : i32
    %c0_i32_1 = arith.constant 0 : i32
    return %c0_i32, %c0_i32_0 : i32, i32
  }
  func.func @transform_3(%arg0: i32) -> (i32, i32) {
    %c0_i32 = arith.constant 0 : i32
    %c0_i32_0 = arith.constant 0 : i32
    %c0_i32_1 = arith.constant 0 : i32
    return %c0_i32, %c0_i32_0 : i32, i32
  }
  func.func @transform_4(%arg0: i32) -> (i32, i32) {
    %c0_i32 = arith.constant 0 : i32
    %c0_i32_0 = arith.constant 0 : i32
    %c0_i32_1 = arith.constant 0 : i32
    return %c0_i32, %c0_i32_0 : i32, i32
  }
  func.func @transform_5(%arg0: i32) -> (i32, i32, i32) {
    %c0_i32 = arith.constant 0 : i32
    %c0_i32_0 = arith.constant 0 : i32
    %c0_i32_1 = arith.constant 0 : i32
    return %arg0, %c0_i32, %c0_i32_0 : i32, i32, i32
  }
}

</mosaic_0001>

<bundles_post_ra>
// kernel: tpu_custom_call.1
= control target key start
LH: loop header
LB: loop body
LE: loop exit
PB: predicated region body
PF: predicated region fallthrough
CT: control target
= control target key end

     0   :  { %10 = vsyncpa [#allocation3], 0  ;;  %s816_s0 = inlined_call_operand.hbm [shape: f32[2,32,256], index: 0, kind: input, shape index: {}]   ;;  %s817_s1 = inlined_call_operand.vmem [shape: f32[32,4], index: 1, kind: input, shape index: {}]   ;;  %s818_s2 = inlined_call_operand.vmem [shape: f32[1,4], index: 2, kind: input, shape index: {}]   ;;  %s819_s3 = inlined_call_operand.vmem [shape: f32[4,32], index: 3, kind: input, shape index: {}]   ;;  %s820_s4 = inlined_call_operand.vmem [shape: f32[2,32], index: 4, kind: input, shape index: {}]   ;;  %s821_s5 = inlined_call_operand.hbm [shape: f32[2,32,256], index: 5, kind: output, shape index: {}]  }
   0x1   :  { %11 = vsyncpa [#allocation4], 0  ;;  %s614_s18 = smov [#allocation2]   ;;  %s566_s22 = scalar_lea.hbm %s816_s0, 2048 }
   0x2   :  { %s17_s19 = sshll.u32 %s614_s18, 4  ;;  %p567_p0 = scmp.ne.s32.totalorder %s816_s0, %s566_s22  ;;  %s18_s19 = int_to_ptr.vmem [resolvable:$true] %s17_s19 }
   0x3   :  { %p570_p1 = scmp.lt.u32.totalorder %s566_s22, %s816_s0 }
   0x5   :  { %p572_p2 = pnand %p570_p1, %p567_p0 }
   0x7   :  { %575 = shalt.err (!%p572_p2)
}
   0x8   :  { %s576_s27 = scalar_lea.vmem %s18_s19, 2048  ;;  %p581_p4 = scmp.lt.s32.totalorder %s18_s19, %s18_s19 }
   0x9   :  { %p577_p3 = scmp.ne.s32.totalorder %s18_s19, %s576_s27  ;;  %p582_p5 = scmp.lt.s32.totalorder %s576_s27, %s576_s27 }
   0xb   :  { %p583_p6 = por %p582_p5, %p581_p4 }
   0xd   :  { %p584_p7 = pnand %p583_p6, %p577_p3 }
   0xf   :  { %587 = shalt.err (!%p584_p7)
}
  0x10   :  { %s615_s28 = smov 256   ;;  %s616_s29 = smov 16  }
  0x11   :  { %23 = dma.hbm_to_vmem [thread:$0]  %s816_s0, 2048, %s18_s19, [#allocation3], %s615_s28, %s615_s28, %s616_s29  }
  0x12   :  { %610 = dma.done.wait [#allocation3], 2048  }
  0x13   :  { %611 = vsyncadd [#allocation3], 4294965248  ;;  %v667_v0 = vld [vmem:[#allocation2 + $0x40] sm:$0xff]  ;;  %v669_v1 = vld [vmem:[#allocation2 + $0x48] sm:$0xff]  ;;  %v617_v35 = vmov 0.0|0.0   ;;  %vm618_vm0 = vmmov 0   ;;  %v115_v45 = vlaneseq }
  0x14   :  { %v671_v2 = vld [vmem:[#allocation2] sm:$0xff]  ;;  %v87_v3 = vadd.f32 %v669_v1, %v667_v0  ;;  %v675_v4 = vld [vmem:[#allocation2 + $0x8] sm:$0xff]  ;;  %v677_v5 = vld [vmem:[#allocation2 + $0x50] sm:$0xff]  ;;  %v63_v21 = vmax.f32 %v667_v0, %v669_v1  ;;  %540 = vmatprep.subr.bf16.mxu0 %v617_v35  ;;  %v619_v39 = vmov 0.0   ;;  %vm126_vm1 = vcmask 130112  }
  0x15   :  { %v679_v6 = vld [vmem:[#allocation2 + $0x58] sm:$0xff]  ;;  %v75_v7 = vadd.f32 %v675_v4, %v671_v2  ;;  %v683_v8 = vld [vmem:[#allocation2 + $0x10] sm:$0xff]  ;;  %v691_v12 = vld [vmem:[#allocation2 + $0x60] sm:$0xff]  ;;  %v51_v19 = vmax.f32 %v671_v2, %v675_v4  ;;  %532 = vmatprep.mubr.msk.f32.mxu0 %vm618_vm0, %v619_v39  ;;  %535 = vmatprep.subr.mxu1 %v619_v39  ;;  %v743_v48 = vand.u32 127, %v115_v45  ;;  %v745_v50 = vshrl.u32 %v115_v45, 7 }
  0x16   :  { %v685_v9 = vld [vmem:[#allocation2 + $0x18] sm:$0xff]  ;;  %88 = vadd.xlane.f32.xlu1 %v87_v3  ;;  %v90_v10 = vadd.f32 %v679_v6, %v677_v5  ;;  %v693_v13 = vld [vmem:[#allocation2 + $0x68] sm:$0xff]  ;;  %v695_v14 = vld [vmem:[#allocation2 + $0x20] sm:$0xff]  ;;  %v66_v20 = vmax.f32 %v677_v5, %v679_v6  ;;  %537 = vmatprep.mubr.msk.f32.mxu1 %vm618_vm0, %v619_v39  ;;  %vm133_vm2 = vcmask 195712   ;;  %vm140_vm3 = vcmask 261312  }
  0x17   :  { %76 = vadd.xlane.f32.xlu0 %v75_v7  ;;  %v78_v11 = vadd.f32 %v685_v9, %v683_v8  ;;  %v697_v15 = vld [vmem:[#allocation2 + $0x28] sm:$0xff]  ;;  %v93_v16 = vadd.f32 %v693_v13, %v691_v12  ;;  %v54_v18 = vmax.f32 %v683_v8, %v685_v9  ;;  %v711_v22 = vld [vmem:[#allocation2 + $0x70] sm:$0xff]  ;;  %v713_v23 = vld [vmem:[#allocation2 + $0x78] sm:$0xff]  ;;  %v69_v28 = vmax.f32 %v691_v12, %v693_v13 }
  0x18   :  { %v81_v17 = vadd.f32 %v697_v15, %v695_v14  ;;  %v715_v24 = vld [vmem:[#allocation2 + $0x30] sm:$0xff]  ;;  %v717_v25 = vld [vmem:[#allocation2 + $0x38] sm:$0xff]  ;;  %v96_v26 = vadd.f32 %v713_v23, %v711_v22  ;;  %v57_v29 = vmax.f32 %v695_v14, %v697_v15  ;;  %v72_v30 = vmax.f32 %v711_v22, %v713_v23  ;;  %v215_v32 = vld [vmem:[%s817_s1] sm:$0xff] }
  0x19   :  { %v84_v27 = vadd.f32 %v717_v25, %v715_v24  ;;  %v60_v31 = vmax.f32 %v715_v24, %v717_v25  ;;  %v216_v33 = vld [vmem:[%s817_s1 + $0x8] sm:$0xff]  ;;  %v217_v36 = vld [vmem:[%s817_s1 + $0x10] sm:$0xff]  ;;  %v218_v37 = vld [vmem:[%s817_s1 + $0x18] sm:$0xff]  ;;  %v121_v51 = vadd.s32 4294967288, %v743_v48  ;;  %v128_v52 = vadd.s32 4294967280, %v743_v48 }
  0x1a   :  { %91 = vadd.xlane.f32.xlu1 %v90_v10  ;;  %v541_v34 = vpack.c.bf16 %v216_v33, %v215_v32  ;;  %v544_v38 = vpack.c.bf16 %v218_v37, %v217_v36  ;;  %v135_v55 = vadd.s32 4294967272, %v743_v48  ;;  %v119_v56 = vsub.s32 %v743_v48, %v745_v50 }
  0x1b   :  { %79 = vadd.xlane.f32.xlu0 %v78_v11  ;;  %v124_v57 = vsub.s32 %v121_v51, %v745_v50  ;;  %v131_v59 = vsub.s32 %v128_v52, %v745_v50  ;;  %vm161_vm4 = vcmask 1041409   ;;  %vm210_vm5 = vcmask 1043459  }
  0x1c   :  { %542 = vmatpush3.bf16.msra.mxu0 %v541_v34  ;;  %v138_v11 = vsub.s32 %v135_v55, %v745_v50  ;;  %vm213_vm6 = vcmask 1041408   ;;  %vm226_vm7 = vcmask 261120   ;;  %vm313_vm8 = vcmask 1043456  }
  0x1d   :  { %543 = vmatprep.subr.bf16.mxu0 %v617_v35  ;;  %vm303_vm9 = vcmp.lt.s32.totalorder %v745_v50, 2  ;;  %vm304_vm10 = vcmp.lt.s32.totalorder %v743_v48, 2  ;;  %vm620_vm12 = vmmov 1   ;;  %vm309_vm14 = vcmask 31744   ;;  %v514_v48 = vld [vmem:[%s820_s4 + $0x1] ss:$0 sm:$0xff] }
  0x1e   :  { %94 = vadd.xlane.f32.xlu1 %v93_v16  ;;  %vm305_vm11 = vmxor %vm303_vm9, %vm304_vm10 }
  0x1f   :  { %82 = vadd.xlane.f32.xlu0 %v81_v17  ;;  %vm306_vm13 = vmxor %vm305_vm11, %vm620_vm12 }
  0x20   :  { %545 = vmatpush3.bf16.msra.mxu0 %v544_v38 }
  0x22   :  { %55 = vmax.xlane.f32.xlu1 %v54_v18 }
  0x23   :  { %52 = vmax.xlane.f32.xlu0 %v51_v19 }
  0x26   :  { %67 = vmax.xlane.f32.xlu1 %v66_v20 }
  0x27   :  { %64 = vmax.xlane.f32.xlu0 %v63_v21 }
  0x2a   :  { %97 = vadd.xlane.f32.xlu1 %v96_v26 }
  0x2b   :  { %85 = vadd.xlane.f32.xlu0 %v84_v27 }
  0x2e   :  { %70 = vmax.xlane.f32.xlu1 %v69_v28 }
  0x2f   :  { %58 = vmax.xlane.f32.xlu0 %v57_v29 }
  0x32   :  { %73 = vmax.xlane.f32.xlu1 %v72_v30 }
  0x33   :  { %61 = vmax.xlane.f32.xlu0 %v60_v31 }
  0xa3   :  { %v89_v40 = vpop.xlane.xlu1 %88 }
  0xa4   :  { %v77_v41 = vpop.xlane.xlu0 %76  ;;  %v103_v60 = vmul.f32 0.00390625, %v89_v40 }
  0xa5   :  { %v99_v10 = vmul.f32 0.00390625, %v77_v41 }
  0xa6   :  { %v194_v19 = vrot.slane %v103_v60, %v119_v56  ;;  %v508_v60 = vld [vmem:[%s818_s2] ss:$0 sm:$0xff]  ;;  %s621_s2 = smov [#allocation5]  }
  0xa7   :  { %v92_v42 = vpop.xlane.xlu1 %91  ;;  %v175_v33 = vrot.slane %v99_v10, %v119_v56  ;;  %v512_v10 = vld [vmem:[%s820_s4] ss:$0 sm:$0xff]  ;;  %s496_s4 = sshll.u32 %s621_s2, 4  ;;  %s497_s4 = int_to_ptr.vmem [resolvable:$true] %s496_s4 }
  0xa8   :  { %v80_v43 = vpop.xlane.xlu0 %79  ;;  %v104_v58 = vmul.f32 0.00390625, %v92_v42  ;;  %s588_s20 = scalar_lea.vmem %s497_s4, 2048  ;;  %p593_p9 = scmp.lt.s32.totalorder %s497_s4, %s497_s4 }
  0xa9   :  { %v100_v61 = vmul.f32 0.00390625, %v80_v43  ;;  %p589_p8 = scmp.ne.s32.totalorder %s497_s4, %s588_s20  ;;  %p594_p10 = scmp.lt.s32.totalorder %s588_s20, %s588_s20 }
  0xaa   :  { %v198_v18 = vrot.slane %v104_v58, %v124_v57 }
  0xab   :  { %v95_v44 = vpop.xlane.xlu1 %94  ;;  %v179_v20 = vrot.slane %v100_v61, %v124_v57  ;;  %p595_p11 = por %p594_p10, %p593_p9 }
  0xac   :  { %v83_v46 = vpop.xlane.xlu0 %82  ;;  %v105_v62 = vmul.f32 0.00390625, %v95_v44  ;;  %v199_v37 = vsel %vm126_vm1, %v198_v18, %v194_v19 }
  0xad   :  { %v101_v63 = vmul.f32 0.00390625, %v83_v46  ;;  %v180_v39 = vsel %vm126_vm1, %v179_v20, %v175_v33  ;;  %p596_p12 = pnand %p595_p11, %p589_p8 }
  0xae   :  { %v203_v21 = vrot.slane %v105_v62, %v131_v59 }
  0xaf   :  { %v56_v47 = vpop.xlane.xlu1 %55  ;;  %v184_v26 = vrot.slane %v101_v63, %v131_v59 }
  0xb0   :  { %v53_v49 = vpop.xlane.xlu0 %52  ;;  %v125_v28 = vrot.slane %v56_v47, %v124_v57  ;;  %v204_v40 = vsel %vm133_vm2, %v203_v21, %v199_v37 }
  0xb1   :  { %v120_v29 = vrot.slane %v53_v49, %v119_v56  ;;  %v185_v42 = vsel %vm133_vm2, %v184_v26, %v180_v39  ;;  %v442_v39 = vsub.s32 1, %v745_v50 }
  0xb3   :  { %v68_v53 = vpop.xlane.xlu1 %67  ;;  %v127_v43 = vsel %vm126_vm1, %v125_v28, %v120_v29 }
  0xb4   :  { %v65_v54 = vpop.xlane.xlu0 %64  ;;  %v149_v30 = vrot.slane %v68_v53, %v124_v57 }
  0xb5   :  { %v145_v31 = vrot.slane %v65_v54, %v119_v56 }
  0xb7   :  { %v98_v3 = vpop.xlane.xlu1 %97  ;;  %v150_v44 = vsel %vm126_vm1, %v149_v30, %v145_v31 }
  0xb8   :  { %v86_v7 = vpop.xlane.xlu0 %85  ;;  %v106_v16 = vmul.f32 0.00390625, %v98_v3 }
  0xb9   :  { %v102_v17 = vmul.f32 0.00390625, %v86_v7 }
  0xba   :  { %v208_v34 = vrot.slane %v106_v16, %v138_v11 }
  0xbb   :  { %v71_v27 = vpop.xlane.xlu1 %70  ;;  %v189_v35 = vrot.slane %v102_v17, %v138_v11 }
  0xbc   :  { %v59_v32 = vpop.xlane.xlu0 %58  ;;  %v154_v36 = vrot.slane %v71_v27, %v131_v59  ;;  %v209_v47 = vsel %vm140_vm3, %v208_v34, %v204_v40 }
  0xbd   :  { %v132_v38 = vrot.slane %v59_v32, %v131_v59  ;;  %v190_v49 = vsel %vm140_vm3, %v189_v35, %v185_v42  ;;  %v308_v59 = vld [vmem:[%s819_s3] sm:$0xf] }
  0xbe   :  { %v155_v51 = vsel %vm133_vm2, %v154_v36, %v150_v44  ;;  %v211_v57 = vsel %vm210_vm5, %v209_v47, %v190_v49  ;;  %536 = vmatpush3.msk.msra.mxu1 %vm313_vm8, %v308_v59  ;;  %v423_v36 = vsub.s32 0, %v745_v50 }
  0xbf   :  { %v74_v41 = vpop.xlane.xlu1 %73  ;;  %v134_v53 = vsel %vm133_vm2, %v132_v38, %v127_v43 }
  0xc0   :  { %v159_v45 = vrot.slane %v74_v41, %v138_v11  ;;  %v62_v46 = vpop.xlane.xlu0 %61 }
  0xc1   :  { %v139_v52 = vrot.slane %v62_v46, %v138_v11 }
  0xc2   :  { %v160_v54 = vsel %vm140_vm3, %v159_v45, %v155_v51 }
  0xc3   :  { %v141_v55 = vsel %vm140_vm3, %v139_v52, %v134_v53 }
  0xc4   :  { %v162_v56 = vsel %vm161_vm4, %v160_v54, %v141_v55 }
  0xc5   :  { %v214_v58 = vsel %vm213_vm6, %v162_v56, %v211_v57 }
  0xc6   :  { %533 = vmatmul.mubr.msk.f32.vlgmr.msra.gmra.mrb[0].mxu0 %vm226_vm7, %v214_v58 }
 0x199   :  { %v296_v61 = vpop.f32.mrb[0].mxu0 }
 0x19a   :  { %v297_v62 = vadd.f32 %v508_v60, %v296_v61  ;;  %v534_v63 = vpop.f32.mrb[1].mxu0 }
 0x19c   :  { %v300_v3 = vmax.f32 %v297_v62, 0.0 }
 0x19e   :  { %v307_v7 = vsel %vm306_vm13, %v300_v3, 0.0 }
 0x19f   :  { %538 = vmatmul.mubr.msk.f32.vlgmr.msra.gmra.mrb[0].mxu1 %vm309_vm14, %v307_v7 }
 0x272   :  { %v383_v11 = vpop.f32.mrb[0].mxu1 }
 0x273   :  { %v392_v16 = vadd.f32 %v512_v10, %v383_v11  ;;  %v404_v17 = vadd.f32 %v514_v48, %v383_v11  ;;  %v539_v18 = vpop.f32.mrb[1].mxu1 }
 0x275   :  { %v513_v19 = vmul.f32 -1.442695, %v392_v16  ;;  %v515_v20 = vmul.f32 -1.442695, %v404_v17 }
 0x277   :  { %554 = vpow2.f32 %v513_v19 }
 0x278   :  { %556 = vpow2.f32 %v515_v20 }
 0x281   :  { %v555_v21 = vpop.eup %554 }
 0x282   :  { %v557_v26 = vpop.eup %556  ;;  %v396_v27 = vadd.f32 1.0, %v555_v21 }
 0x283   :  { %v408_v28 = vadd.f32 1.0, %v557_v26 }
 0x285   :  { %558 = vrcp.f32 %v408_v28 }
 0x286   :  { %560 = vrcp.f32 %v396_v27 }
 0x28f   :  { %v559_v29 = vpop.eup %558 }
 0x290   :  { %v412_v30 = vrot.slane %v559_v29, 2  ;;  %v561_v31 = vpop.eup %560 }
 0x292   :  { %v414_v32 = vadd.f32 %v561_v31, %v412_v30 }
 0x294   :  { %v516_v33 = vmul.f32 -1.442695, %v414_v32 }
 0x296   :  { %562 = vpow2.f32 %v516_v33 }
 0x2a0   :  { %v563_v34 = vpop.eup %562 }
 0x2a1   :  { %v418_v35 = vadd.f32 1.0, %v563_v34 }
 0x2a3   :  { %564 = vrcp.f32 %v418_v35 }
 0x2ad   :  { %v565_v37 = vpop.eup %564 }
 0x2ae   :  { %v424_v38 = vrot.slane %v565_v37, %v423_v36  ;;  %v443_v40 = vrot.slane %v565_v37, %v442_v39 }
 0x2b0   :  { %430 = vbcast.lane.b32.xlu1 %v424_v38, 264  ;;  %426 = vbcast.lane.b32.xlu0 %v424_v38, 256 }
 0x2b4   :  { %434 = vbcast.lane.b32.xlu1 %v424_v38, 272  ;;  %445 = vbcast.lane.b32.xlu0 %v443_v40, 256 }
 0x2b8   :  { %438 = vbcast.lane.b32.xlu1 %v424_v38, 280  ;;  %453 = vbcast.lane.b32.xlu0 %v443_v40, 272 }
 0x2bc   :  { %449 = vbcast.lane.b32.xlu1 %v443_v40, 264 }
 0x2c0   :  { %457 = vbcast.lane.b32.xlu1 %v443_v40, 280 }
 0x322   :  { %v431_v41 = vpop.permute.xlu1 %430  ;;  %v427_v42 = vpop.permute.xlu0 %426 }
 0x323   :  { %v461_v43 = vmul.f32 %v431_v41, %v683_v8  ;;  %v462_v44 = vmul.f32 %v431_v41, %v685_v9  ;;  %v459_v45 = vmul.f32 %v427_v42, %v671_v2  ;;  %v460_v46 = vmul.f32 %v427_v42, %v675_v4 }
 0x325   :  { %477 = vst [vmem:[#allocation5 + $0x10] sm:$0xff] %v461_v43  ;;  %478 = vst [vmem:[#allocation5 + $0x18] sm:$0xff] %v462_v44 }
 0x326   :  { %475 = vst [vmem:[#allocation5] sm:$0xff] %v459_v45  ;;  %476 = vst [vmem:[#allocation5 + $0x8] sm:$0xff] %v460_v46  ;;  %v435_v50 = vpop.permute.xlu1 %434  ;;  %v446_v47 = vpop.permute.xlu0 %445 }
 0x327   :  { %v463_v49 = vmul.f32 %v435_v50, %v695_v14  ;;  %v464_v51 = vmul.f32 %v435_v50, %v697_v15  ;;  %v467_v52 = vmul.f32 %v446_v47, %v667_v0  ;;  %v468_v8 = vmul.f32 %v446_v47, %v669_v1 }
 0x329   :  { %479 = vst [vmem:[#allocation5 + $0x20] sm:$0xff] %v463_v49  ;;  %480 = vst [vmem:[#allocation5 + $0x28] sm:$0xff] %v464_v51 }
 0x32a   :  { %483 = vst [vmem:[#allocation5 + $0x40] sm:$0xff] %v467_v52  ;;  %484 = vst [vmem:[#allocation5 + $0x48] sm:$0xff] %v468_v8  ;;  %v439_v2 = vpop.permute.xlu1 %438  ;;  %v454_v4 = vpop.permute.xlu0 %453 }
 0x32b   :  { %v465_v9 = vmul.f32 %v439_v2, %v715_v24  ;;  %v466_v53 = vmul.f32 %v439_v2, %v717_v25  ;;  %v471_v54 = vmul.f32 %v454_v4, %v691_v12  ;;  %v472_v14 = vmul.f32 %v454_v4, %v693_v13 }
 0x32d   :  { %481 = vst [vmem:[#allocation5 + $0x30] sm:$0xff] %v465_v9  ;;  %482 = vst [vmem:[#allocation5 + $0x38] sm:$0xff] %v466_v53 }
 0x32e   :  { %487 = vst [vmem:[#allocation5 + $0x60] sm:$0xff] %v471_v54  ;;  %488 = vst [vmem:[#allocation5 + $0x68] sm:$0xff] %v472_v14  ;;  %v450_v0 = vpop.permute.xlu1 %449 }
 0x32f   :  { %v469_v1 = vmul.f32 %v450_v0, %v677_v5  ;;  %v470_v15 = vmul.f32 %v450_v0, %v679_v6 }
 0x331   :  { %485 = vst [vmem:[#allocation5 + $0x50] sm:$0xff] %v469_v1  ;;  %486 = vst [vmem:[#allocation5 + $0x58] sm:$0xff] %v470_v15 }
 0x332   :  { %v458_v24 = vpop.permute.xlu1 %457 }
 0x333   :  { %v473_v25 = vmul.f32 %v458_v24, %v711_v22  ;;  %v474_v12 = vmul.f32 %v458_v24, %v713_v23 }
 0x335   :  { %489 = vst [vmem:[#allocation5 + $0x70] sm:$0xff] %v473_v25  ;;  %490 = vst [vmem:[#allocation5 + $0x78] sm:$0xff] %v474_v12 }
 0x336   :  { %599 = shalt.err (!%p596_p12)
}
 0x337   :  { %s600_s23 = scalar_lea.hbm %s821_s5, 2048 }
 0x338   :  { %p601_p13 = scmp.ne.s32.totalorder %s821_s5, %s600_s23  ;;  %p604_p0 = scmp.lt.u32.totalorder %s600_s23, %s821_s5 }
 0x33a   :  { %p606_p1 = pnand %p604_p0, %p601_p13 }
 0x33c   :  { %609 = shalt.err (!%p606_p1)
}
 0x33d   :  { %502 = dma.vmem_to_hbm [thread:$0]  %s497_s4, 2048, %s821_s5, [#allocation4], %s615_s28, %s615_s28, %s616_s29  }
 0x33e   :  { %612 = dma.done.wait [#allocation4], 2048  }
 0x33f   :  { %613 = vsyncadd [#allocation4], 4294965248 }
 0x340   :  { %506 = vsyncpa [#allocation3], 1 }
 0x341   :  { %507 = vsyncpa [#allocation4], 1 }

</bundles_post_ra>
